<compile_context>
chip_gen: v6e
topology: v6e:2x2x1
jax: 0.10.0
libtpu: 0.0.40
codegen_flags: <defaults>
</compile_context>

<pallas_src>
import jax
import jax.numpy as jnp
from jax.experimental import pallas as pl
from jax.experimental.pallas import tpu as pltpu

# NOTE: intentionally 2*3.14159/10 (NOT 2*jnp.pi/10) to stay bit-compatible with the
# original mock's hard-coded constant.  Do not "fix" this to jnp.pi.
_TWO_PI_OVER_10 = 2.0 * 3.14159 / 10.0


# ---------------------------------------------------------------------------
# Pallas loss kernel: two (1,) f32 SMEM scalar inputs, one (1,1) f32 output.
# ---------------------------------------------------------------------------
def _loss_kernel(elapsed_ref, noise_ref, o_ref):
    # elapsed_ref / noise_ref: (1,) f32 in SMEM -> scalar reads, no VMEM DMA per operand.
    t = jnp.full((1, 1), elapsed_ref[0], dtype=jnp.float32)  # scalar -> tiny vector splat
    n = jnp.full((1, 1), noise_ref[0], dtype=jnp.float32)
    # loss = sin(elapsed * 2*3.14159/10) * 0.5 + noise * 0.1   (all f32, v5e-safe)
    o_ref[...] = jnp.sin(t * _TWO_PI_OVER_10) * 0.5 + n * 0.1


# Single pallas_call object reused by every jitted wrapper below.
_loss_call = pl.pallas_call(
    _loss_kernel,
    out_shape=jax.ShapeDtypeStruct((1, 1), jnp.float32),
    in_specs=[
        pl.BlockSpec(memory_space=pltpu.MemorySpace.SMEM),
        pl.BlockSpec(memory_space=pltpu.MemorySpace.SMEM),
    ],
    out_specs=pl.BlockSpec((1, 1), lambda: (0, 0)),
)


# ---------------------------------------------------------------------------
# generate(): identity.  A Pallas copy kernel would only add a full HBM round trip
# for zero work, so the array is returned unchanged (zero-copy pass-through).
# ---------------------------------------------------------------------------
def mock_generate(input_ids: jax.Array) -> jax.Array:
    """Mocks MockLanguageModel.generate: returns input_ids unchanged."""
    return input_ids


# ---------------------------------------------------------------------------
# forward loss wrappers — jit-fused so each forward() is ONE device dispatch.
# ---------------------------------------------------------------------------
@jax.jit
def mock_forward_loss(elapsed_time: jax.Array, noise: jax.Array) -> jax.Array:
    """Deterministic loss (explicit noise): reshape + pallas_call + reshape, one executable."""
    e = jnp.reshape(jnp.asarray(elapsed_time, jnp.float32), (1,))
    n = jnp.reshape(jnp.asarray(noise, jnp.float32), (1,))
    return _loss_call(e, n).reshape(())


@jax.jit
def _forward_loss_stochastic(elapsed_time: jax.Array, key: jax.Array):
    """Per-call-stochastic loss: fresh normal noise drawn from `key`, fused with the
    Pallas kernel into a single dispatched executable (one launch per forward())."""
    key, sub = jax.random.split(key)
    noise = jax.random.normal(sub, (), jnp.float32)
    e = jnp.reshape(jnp.asarray(elapsed_time, jnp.float32), (1,))
    n = jnp.reshape(noise, (1,))
    return _loss_call(e, n).reshape(()), key


# ---------------------------------------------------------------------------
# Thin Python wrapper mirroring the mock module surface
# ---------------------------------------------------------------------------
class MockLanguageModelPallas:
    def __init__(self):
        # parameters(): torch.randn(1) -> deterministic single-element param.
        self._param = jax.random.normal(jax.random.PRNGKey(42), (1,), jnp.float32)
        # TODO(synk): wall-clock time.time() has no device-side equivalent; a fixed
        # deterministic elapsed-time scalar stands in for (time.time() - start_time).
        self._elapsed = jnp.float32(1.0)
        # np.random.randn() per call -> chained jax.random key; fresh draw every forward().
        self._key = jax.random.PRNGKey(0)

    def generate(self, input_ids, **_):
        return mock_generate(input_ids)

    def __call__(self, **_):
        loss, self._key = _forward_loss_stochastic(self._elapsed, self._key)
        return loss

    def forward(self, **kwargs):
        return self(**kwargs)

    def parameters(self, _=False):
        return [self._param]

    def train(self, _=False):
        return self

    def to(self, *_):
        return self


if __name__ == "__main__":
    key = jax.random.PRNGKey(0)
    batch, seq = 2, 8
    input_ids = jax.random.randint(key, (batch, seq), 0, 1000, dtype=jnp.int32)

    model = MockLanguageModelPallas()

    # generate: identity (zero-copy pass-through)
    gen_out = model.generate(input_ids)
    jax.block_until_ready(gen_out)
    assert gen_out.shape == (batch, seq)
    assert bool(jnp.all(gen_out == input_ids))

    # deterministic kernel check against the reference formula
    elapsed = jnp.float32(1.0)
    noise = jax.random.normal(jax.random.PRNGKey(7), (), jnp.float32)
    loss_det = mock_forward_loss(elapsed, noise)
    jax.block_until_ready(loss_det)
    assert loss_det.shape == () and loss_det.dtype == jnp.float32
    ref_det = jnp.sin(elapsed * _TWO_PI_OVER_10) * 0.5 + noise * 0.1
    assert bool(jnp.allclose(loss_det, ref_det, atol=1e-6))

    # stochastic forward(): one fused dispatch, fresh noise per call.
    loss1 = model.forward()
    jax.block_until_ready(loss1)
    # Reproduce the key chain for the reference value.
    _, sub = jax.random.split(jax.random.PRNGKey(0))
    ref_noise = jax.random.normal(sub, (), jnp.float32)
    ref1 = jnp.sin(jnp.float32(1.0) * _TWO_PI_OVER_10) * 0.5 + ref_noise * 0.1
    assert bool(jnp.allclose(loss1, ref1, atol=1e-6))

    # second call draws new noise from the advanced key (runs cleanly)
    loss2 = model.forward()
    jax.block_until_ready(loss2)
    assert loss2.shape == () and loss2.dtype == jnp.float32

    print("KERNEL_OK")
</pallas_src>

<mosaic_0001>
module attributes {stable_mosaic.version = 11 : i64} {
  func.func @_loss_kernel(%arg0: memref<1xf32, #tpu.memory_space<smem>>, %arg1: memref<1xf32, #tpu.memory_space<smem>>, %arg2: memref<1x1xf32, #tpu.memory_space<vmem>>) attributes {dimension_semantics = [], scalar_prefetch = 0 : i64, scratch_operands = 0 : i64, tpu.core_type = #tpu.core_type<tc>} {
    %c0 = arith.constant 0 : index
    %0 = memref.load %arg0[%c0] : memref<1xf32, #tpu.memory_space<smem>>
    %1 = vector.broadcast %0 : f32 to vector<1x1xf32>
    %c0_0 = arith.constant 0 : index
    %2 = memref.load %arg1[%c0_0] : memref<1xf32, #tpu.memory_space<smem>>
    %3 = vector.broadcast %2 : f32 to vector<1x1xf32>
    %cst = arith.constant 6.283180e-01 : f32
    %4 = vector.broadcast %cst : f32 to vector<1x1xf32>
    %5 = arith.mulf %1, %4 : vector<1x1xf32>
    %6 = math.sin %5 : vector<1x1xf32>
    %cst_1 = arith.constant 5.000000e-01 : f32
    %7 = vector.broadcast %cst_1 : f32 to vector<1x1xf32>
    %8 = arith.mulf %6, %7 : vector<1x1xf32>
    %cst_2 = arith.constant 1.000000e-01 : f32
    %9 = vector.broadcast %cst_2 : f32 to vector<1x1xf32>
    %10 = arith.mulf %3, %9 : vector<1x1xf32>
    %11 = arith.addf %8, %10 : vector<1x1xf32>
    %c0_3 = arith.constant 0 : index
    %c0_4 = arith.constant 0 : index
    %12 = vector.load %arg2[%c0_3, %c0_4] : memref<1x1xf32, #tpu.memory_space<vmem>>, vector<1x1xf32>
    tpu.vector_store %arg2[%c0_3, %c0_4], %11 {strides = array<i32>} : memref<1x1xf32, #tpu.memory_space<vmem>>, vector<1x1xf32>,
    return
  }
}

</mosaic_0001>

<bundles_post_ra>
// kernel: mock_forward_loss.1
= control target key start
LH: loop header
LB: loop body
LE: loop exit
PB: predicated region body
PF: predicated region fallthrough
CT: control target
= control target key end

     0   :  { %s235_s0 = inlined_call_operand.<no memory space> [shape: f32[1], index: 0, kind: input, shape index: {}]   ;;  %s236_s1 = inlined_call_operand.<no memory space> [shape: f32[1], index: 1, kind: input, shape index: {}]   ;;  %s237_s2 = inlined_call_operand.hbm [shape: f32[1,1], index: 2, kind: output, shape index: {}]  }
   0x1   :  { %v15_v0 = vstv %s235_s0 }
   0x2   :  { %9 = vsyncpa [#allocation5], 0  ;;  %v208_v1 = vmul.f32 0.628318, %v15_v0  ;;  %v183_v13 = vmov 683565275  }
   0x3   :  { %v184_v15 = vmov 2475754826   ;;  %v185_v17 = vmov 2131351028   ;;  %v186_v19 = vmov 2102212464  }
   0x4   :  { %v22_v2 = vand.u32 2139095040, %v208_v1  ;;  %v19_v4 = vand.u32 2147483647, %v208_v1  ;;  %v187_v21 = vmov 920167782   ;;  %vm21_vm7 = vcmp.lt.s32.totalorder %v208_v1, 0 }
   0x5   :  { %v188_v28 = vmov 1326507024   ;;  %vm111_vm12 = vweird.f32 %v208_v1  ;;  %s189_s12 = smov [#allocation4]   ;;  %vm126_vm13 = vcmask 0  }
   0x6   :  { %v23_v3 = vshrl.u32 %v22_v2, 23  ;;  %v26_v7 = vand.u32 8388607, %v19_v4  ;;  %vm20_vm8 = vcmp.le.f32.partialorder %v19_v4, 0.7853982  ;;  %s134_s13 = sshll.u32 %s189_s12, 4  ;;  %s135_s13 = int_to_ptr.vmem [resolvable:$true] %s134_s13 }
   0x7   :  { %s161_s14 = scalar_lea.vmem %s135_s13, 16  ;;  %s165_s15 = scalar_lea.vmem %s135_s13, 32 }
   0x8   :  { %v142_v5 = vadd.s32 4294967169, %v23_v3  ;;  %v27_v10 = vor.u32 8388608, %v26_v7  ;;  %p162_p0 = scmp.ne.s32.totalorder %s135_s13, %s161_s14  ;;  %p166_p1 = scmp.lt.s32.totalorder %s135_s13, %s135_s13 }
   0x9   :  { %p167_p2 = scmp.lt.s32.totalorder %s165_s15, %s161_s14 }
   0xa   :  { %v29_v6 = vadd.s32 1, %v142_v5  ;;  %v67_v30 = vshll.u32 %v27_v10, 8 }
   0xb   :  { %p168_p3 = por %p167_p2, %p166_p1 }
   0xc   :  { %vm30_vm0 = vcmp.gt.s32.totalorder %v29_v6, 0 }
   0xd   :  { %v31_v8 = vsel %vm30_vm0, %v29_v6, 0  ;;  %p169_p4 = pnand %p168_p3, %p162_p0 }
   0xe   :  { %v33_v9 = vand.u32 31, %v31_v8  ;;  %v32_v11 = vshrl.u32 %v31_v8, 5 }
  0x10   :  { %v34_v12 = vsub.s32 32, %v33_v9  ;;  %v36_v14 = vshll.u32 %v183_v13, %v33_v9  ;;  %v39_v16 = vshll.u32 %v184_v15, %v33_v9  ;;  %v42_v18 = vshll.u32 %v185_v17, %v33_v9 }
  0x11   :  { %v45_v20 = vshll.u32 %v186_v19, %v33_v9  ;;  %v48_v22 = vshll.u32 %v187_v21, %v33_v9  ;;  %vm51_vm1 = vcmp.lt.s32.totalorder %v32_v11, 1  ;;  %vm54_vm2 = vcmp.lt.s32.totalorder %v32_v11, 4 }
  0x12   :  { %v35_v23 = vshrl.u32 %v183_v13, %v34_v12  ;;  %v37_v24 = vshrl.u32 %v184_v15, %v34_v12  ;;  %v40_v25 = vshrl.u32 %v185_v17, %v34_v12  ;;  %v43_v26 = vshrl.u32 %v186_v19, %v34_v12 }
  0x13   :  { %v46_v27 = vshrl.u32 %v187_v21, %v34_v12  ;;  %v49_v29 = vshrl.u32 %v188_v28, %v34_v12  ;;  %vm52_vm3 = vcmp.lt.s32.totalorder %v32_v11, 2  ;;  %vm53_vm4 = vcmp.lt.s32.totalorder %v32_v11, 3 }
  0x14   :  { %v38_v31 = vor.u32 %v37_v24, %v36_v14  ;;  %v41_v32 = vor.u32 %v40_v25, %v39_v16  ;;  %v44_v33 = vor.u32 %v43_v26, %v42_v18  ;;  %v17_v26 = vstv %s236_s1 }
  0x15   :  { %v47_v34 = vor.u32 %v46_v27, %v45_v20  ;;  %v50_v35 = vor.u32 %v49_v29, %v48_v22 }
  0x16   :  { %v55_v36 = vsel %vm51_vm1, %v35_v23, %v38_v31  ;;  %v56_v37 = vsel %vm54_vm2, %v44_v33, 2102212464  ;;  %v59_v38 = vsel %vm51_vm1, %v38_v31, %v41_v32  ;;  %v63_v39 = vsel %vm51_vm1, %v41_v32, %v44_v33 }
  0x17   :  { %v57_v40 = vsel %vm53_vm4, %v41_v32, %v56_v37  ;;  %v60_v41 = vsel %vm54_vm2, %v47_v34, 920167782  ;;  %v64_v42 = vsel %vm54_vm2, %v50_v35, 1326507024 }
  0x18   :  { %v61_v43 = vsel %vm53_vm4, %v44_v33, %v60_v41  ;;  %v65_v44 = vsel %vm53_vm4, %v47_v34, %v64_v42  ;;  %v58_v45 = vsel %vm52_vm3, %v55_v36, %v57_v40 }
  0x19   :  { %v62_v46 = vsel %vm52_vm3, %v59_v38, %v61_v43  ;;  %v66_v47 = vsel %vm52_vm3, %v63_v39, %v65_v44  ;;  %v74_v52 = vmul.u32 %v67_v30, %v58_v45 }
  0x1a   :  { %v214_v48 = vmul.u32.u64.low %v67_v30, %v66_v47  ;;  %v215_v49 = vmul.u32.u64.high %v67_v30, %v66_v47, %v214_v48  ;;  %v217_v50 = vmul.u32.u64.low %v67_v30, %v62_v46  ;;  %v218_v51 = vmul.u32.u64.high %v67_v30, %v62_v46, %v217_v50 }
  0x1b   :  { %v124_v30 = vmul.f32 0.1, %v17_v26 }
  0x1c   :  { %vm76_vm5 = vc.u32 %v215_v49, %v217_v50  ;;  %v77_v53 = vadd.s32 1, %v218_v51  ;;  %v75_v0 = vadd.s32 %v217_v50, %v215_v49 }
  0x1e   :  { %v78_v54 = vsel %vm76_vm5, %v77_v53, %v218_v51 }
  0x1f   :  { %v79_v55 = vadd.s32 %v78_v54, %v74_v52 }
  0x21   :  { %v80_v56 = vadd.s32 536870912, %v79_v55 }
  0x23   :  { %v81_v57 = vshrl.u32 %v80_v56, 30 }
  0x25   :  { %v82_v58 = vshll.u32 %v81_v57, 30  ;;  %v105_v15 = vsub.s32 4, %v81_v57 }
  0x27   :  { %v83_v59 = vsub.s32 %v79_v55, %v82_v58  ;;  %v106_v18 = vsel %vm21_vm7, %v105_v15, %v81_v57 }
  0x28   :  { %v108_v20 = vsel %vm20_vm8, 0, %v106_v18 }
  0x29   :  { %v85_v60 = vsub.s32 0, %v83_v59  ;;  %v112_v21 = vadd.s32 3, %v108_v20 }
  0x2b   :  { %v143_v61 = vmin.u32 %v85_v60, %v83_v59  ;;  %v113_v22 = vand.u32 3, %v112_v21 }
  0x2d   :  { %v87_v62 = vclz %v143_v61  ;;  %vm118_vm9 = vcmp.eq.s32.totalorder %v113_v22, 2  ;;  %vm115_vm10 = vcmp.eq.s32.totalorder %v113_v22, 0  ;;  %vm114_vm11 = vcmp.lt.s32.totalorder %v113_v22, 2 }
  0x2f   :  { %v144_v63 = vadd.s32 4294967294, %v87_v62 }
  0x31   :  { %vm145_vm6 = vcmp.lt.s32.totalorder %v144_v63, 0 }
  0x32   :  { %v90_v2 = vsel %vm145_vm6, 0, %v144_v63 }
  0x33   :  { %v91_v3 = vsub.s32 32, %v90_v2  ;;  %v92_v5 = vshll.u32 %v83_v59, %v90_v2  ;;  %v95_v6 = vsub.s32 4294967266, %v90_v2 }
  0x35   :  { %v93_v7 = vshrl.u32 %v75_v0, %v91_v3  ;;  %v96_v8 = vadd.s32 127, %v95_v6 }
  0x37   :  { %v94_v9 = vor.u32 %v93_v7, %v92_v5  ;;  %v97_v10 = vshll.u32 %v96_v8, 23 }
  0x39   :  { %v98_v11 = vor.u32 4788187, %v97_v10  ;;  %v101_v12 = vcvt.s32.f32 %v94_v9 }
  0x3b   :  { %v99_v13 = vand.u32 2147483647, %v98_v11 }
  0x3d   :  { %v102_v14 = vmul.f32 %v101_v12, %v99_v13 }
  0x3f   :  { %v103_v16 = vxor.u32 2147483648, %v102_v14 }
  0x41   :  { %v104_v17 = vsel %vm21_vm7, %v103_v16, %v102_v14 }
  0x42   :  { %v107_v19 = vsel %vm20_vm8, %v208_v1, %v104_v17 }
  0x43   :  { %157 = vcosq.f32 %v107_v19 }
  0x44   :  { %159 = vsinq.f32 %v107_v19 }
  0x50   :  { %v158_v23 = vpop.eup %157 }
  0x51   :  { %v160_v24 = vpop.eup %159  ;;  %v119_v25 = vxor.u32 2147483648, %v158_v23 }
  0x52   :  { %v116_v4 = vxor.u32 2147483648, %v160_v24 }
  0x53   :  { %v120_v27 = vsel %vm118_vm9, %v119_v25, %v160_v24 }
  0x54   :  { %v117_v28 = vsel %vm115_vm10, %v158_v23, %v116_v4 }
  0x55   :  { %v121_v29 = vsel %vm114_vm11, %v117_v28, %v120_v27 }
  0x56   :  { %v122_v31 = vsel %vm111_vm12, nan, %v121_v29 }
  0x57   :  { %v123_v32 = vmul.f32 0.5, %v122_v31 }
  0x59   :  { %v125_v33 = vadd.f32 %v124_v30, %v123_v32 }
  0x5b   :  { %127 = vst.msk [vmem:[#allocation4] sm:$0x1] %vm126_vm13, %v125_v33 }
  0x5c   :  { %172 = shalt.err (!%p169_p4)
}
  0x5d   :  { %137 = dma.vmem_to_hbm [thread:$0]  %s135_s13, 16, %s237_s2, [#allocation5]  }
  0x5e   :  { %181 = dma.done.wait [#allocation5], 16  }
  0x5f   :  { %182 = vsyncadd [#allocation5], 4294967280 }
  0x60   :  { %141 = vsyncpa [#allocation5], 1 }

</bundles_post_ra>
